<compile_context>
chip_gen: v5e
topology: v5e:2x2
jax: 0.10.0
libtpu: 0.0.40
codegen_flags: <defaults>
</compile_context>

<pallas_src>
import functools

import jax
import jax.numpy as jnp
from jax.experimental import pallas as pl
from jax.experimental.pallas import tpu as pltpu


# ---------------------------------------------------------------------------
# Prep kernel: adjacency + per-node bias, computed once per forward call.
# ---------------------------------------------------------------------------
def _prep_kernel(e_ref, bp_ref, a_ref, bias_ref):
    """A = softmax(relu(E @ E^T), axis=1) stored bf16; bias = E @ bias_pool (f32)."""
    E = e_ref[...]                                                   # (N, D) f32
    logits = jnp.dot(E, E.T, preferred_element_type=jnp.float32)     # (N, N)
    logits = jnp.maximum(logits, 0.0)
    m = jnp.max(logits, axis=1, keepdims=True)
    ex = jnp.exp(logits - m)
    denom = jnp.sum(ex, axis=1, keepdims=True)
    a_ref[...] = (ex / denom).astype(a_ref.dtype)                    # exact softmax
    bias_ref[...] = jnp.dot(E, bp_ref[...], preferred_element_type=jnp.float32)


# ---------------------------------------------------------------------------
# Main kernel: one grid step = one batch block of TB elements.
# ---------------------------------------------------------------------------
def _avwgcn_kernel(x_ref, a_ref, e_ref, w_ref, b_ref, o_ref,
                   *, N, D, K, CI, CO, TB, TC):
    x = x_ref[...]            # (N, TB*CI)    bf16, lanes (batch-major, channel-minor)
    A = a_ref[...]            # (N, N)        bf16
    E = e_ref[...]            # (N, D)        f32
    W = w_ref[...]            # (D, K*CI, CO) bf16, middle dim ordered (k, i)
    bias = b_ref[...]         # (N, CO)       f32

    # --- Chebyshev recursion in feature space: one wide (N,N)@(N,TB*CI) MXU matmul
    #     per order.  Only a rolling f32 pair is carried for the recursion; bf16
    #     copies of each order are kept because they feed the MXU / projection.
    xg = [x]                                                         # k = 0 (identity)
    cur = jnp.dot(A, x, preferred_element_type=jnp.float32)          # k = 1, f32
    prev = x.astype(jnp.float32)
    xg.append(cur.astype(jnp.bfloat16))
    for _ in range(2, K):
        nxt = (2.0 * jnp.dot(A, xg[-1], preferred_element_type=jnp.float32) - prev)
        prev, cur = cur, nxt
        xg.append(nxt.astype(jnp.bfloat16))

    # --- Hoisted row tilings for the (t, n)-major row-stacked projection.
    if TC > 1:
        bias_rows = jnp.concatenate([bias] * TC, axis=0)             # (TC*N, CO) f32
        e_rows = jnp.concatenate([E] * TC, axis=0)                   # (TC*N, D)  f32
    else:
        bias_rows, e_rows = bias, E

    # --- Projection.  For each chunk of TC batch elements, build a row-stacked
    #     (TC*N, K*CI) operand once and accumulate over d:
    #         out[(t,n), o] = bias[n, o] + sum_d E[n,d] * (xrows @ W[d])[(t,n), o]
    #     One weight push per (chunk, d) amortized over TC*N rows; one dense store
    #     per chunk.  Accumulation stays in f32.
    for c in range(TB // TC):
        cols = []
        for t_local in range(TC):
            t = c * TC + t_local
            cols.append(jnp.concatenate(
                [g[:, t * CI:(t + 1) * CI] for g in xg], axis=1))     # (N, K*CI) bf16
        xrows = cols[0] if TC == 1 else jnp.concatenate(cols, axis=0)  # (TC*N, K*CI)

        acc = bias_rows                                               # (TC*N, CO) f32
        for d in range(D):
            y_d = jnp.dot(xrows, W[d], preferred_element_type=jnp.float32)
            acc = acc + e_rows[:, d:d + 1] * y_d
        o_ref[c * TC * N:(c + 1) * TC * N, :] = acc.astype(o_ref.dtype)


# ---------------------------------------------------------------------------
# Tile selection: VMEM-budget-aware, largest-first.
# ---------------------------------------------------------------------------
def _vmem_limit_bytes():
    cap = None
    try:
        cap = getattr(pltpu.get_tpu_info(), "vmem_capacity_bytes", None)
    except Exception:
        cap = None
    if not cap or cap <= 0:
        cap = 64 * 1024 * 1024          # v7x per-TensorCore physical VMEM (safe floor)
    return int(cap) * 3 // 4            # ~25% headroom for compiler scratch / sems


def _step_bytes(N, D, K, CI, CO, TB, TC):
    """Rough per-grid-step VMEM residency estimate (double-buffered streams)."""
    bf2, f4 = 2, 4
    b = 0
    b += 2 * N * TB * CI * bf2          # x block (double buffered)
    b += 2 * TB * N * CO * f4           # out block (double buffered)
    b += 2 * N * N * bf2                # A (resident)
    b += 2 * N * D * f4                 # E
    b += 2 * D * K * CI * CO * bf2      # W
    b += 2 * N * CO * f4                # bias
    b += K * N * TB * CI * bf2          # bf16 Chebyshev orders (projection operands)
    b += 2 * N * TB * CI * f4           # rolling f32 recursion pair
    b += TC * N * K * CI * bf2          # row-stacked chunk operand
    b += 3 * TC * N * CO * f4           # accumulator + per-d result + store temp
    b += TC * N * (D + CO) * f4         # e_rows / bias_rows tilings
    return b


def _pick_tiles(B, N, D, K, CI, CO, budget, force_tb=None):
    def legal(tb):
        return (B % tb == 0
                and ((tb * CI) % 128 == 0 or tb == B)     # x-block lane tiling
                and ((tb * N) % 8 == 0 or tb == B))       # out-block sublane tiling

    if force_tb is not None:
        assert legal(force_tb), "batch_block must divide B and keep blocks tileable"
        cands = [force_tb]
    else:
        cands = [tb for tb in range(1, B + 1) if legal(tb) and (tb <= 64 or tb == B)]
        if not cands:
            cands = [B]
        cands = sorted(set(cands), reverse=True)
        # Prefer a grid >= 2 so the ("parallel",) batch axis can shard across the
        # two TensorCores on v7x; largest TB first within each group.
        cands = ([tb for tb in cands if B // tb >= 2]
                 + [tb for tb in cands if B // tb < 2])

    def chunk_order(tb):
        divs = [c for c in range(tb, 0, -1) if tb % c == 0]
        return ([c for c in divs if (c * N) % 8 == 0]
                + [c for c in divs if (c * N) % 8 != 0])

    for tb in cands:
        for tc in chunk_order(tb):
            if _step_bytes(N, D, K, CI, CO, tb, tc) <= budget:
                return tb, tc
    return cands[-1], 1


# ---------------------------------------------------------------------------
# Public wrapper.
# ---------------------------------------------------------------------------
def avwgcn_forward(x, node_embeddings, weights_pool, bias_pool, cheb_k,
                   batch_block=None, batch_chunk=None):
    B, N, CI = x.shape
    D = node_embeddings.shape[1]
    CO = bias_pool.shape[1]
    K = cheb_k
    assert K >= 2, "cheb_k must be >= 2 (module always has [I, A] supports)"
    assert weights_pool.shape == (D, K, CI, CO)

    vmem_limit = _vmem_limit_bytes()
    budget = int(vmem_limit * 0.7)      # leave room for temporaries my estimate misses

    TB, TC = _pick_tiles(B, N, D, K, CI, CO, budget, force_tb=batch_block)
    if batch_chunk is not None:
        assert TB % batch_chunk == 0
        TC = batch_chunk
    assert B % TB == 0 and TB % TC == 0

    E = node_embeddings.astype(jnp.float32)

    # ---- tiny prep kernel: adjacency + per-node bias, computed once ---------------
    A_bf, bias = pl.pallas_call(
        _prep_kernel,
        out_shape=(jax.ShapeDtypeStruct((N, N), jnp.bfloat16),
                   jax.ShapeDtypeStruct((N, CO), jnp.float32)),
        in_specs=[pl.BlockSpec(memory_space=pltpu.MemorySpace.VMEM)] * 2,
        out_specs=(pl.BlockSpec(memory_space=pltpu.MemorySpace.VMEM),
                   pl.BlockSpec(memory_space=pltpu.MemorySpace.VMEM)),
        compiler_params=pltpu.CompilerParams(vmem_limit_bytes=vmem_limit),
    )(E, bias_pool.astype(jnp.float32))

    # ---- wrapper-side layout glue (cheap XLA ops) ----------------------------------
    # x: (B, N, CI) -> (N, B*CI), lanes ordered (batch, channel); bf16 MXU operand.
    # TODO(synk): fold this transpose into the kernel via an in-VMEM regroup if the
    # kernel ever becomes HBM-bound (saves one HBM round trip of x).
    x_t = jnp.transpose(x, (1, 0, 2)).reshape(N, B * CI).astype(jnp.bfloat16)
    # weights_pool: (D, K, CI, CO) -> (D, K*CI, CO), middle dim ordered (k, i).
    w3 = weights_pool.reshape(D, K * CI, CO).astype(jnp.bfloat16)

    kernel = functools.partial(_avwgcn_kernel, N=N, D=D, K=K, CI=CI, CO=CO,
                               TB=TB, TC=TC)
    out2d = pl.pallas_call(
        kernel,
        out_shape=jax.ShapeDtypeStruct((B * N, CO), jnp.float32),
        grid_spec=pltpu.PrefetchScalarGridSpec(
            num_scalar_prefetch=0,
            grid=(B // TB,),
            in_specs=[
                pl.BlockSpec((N, TB * CI), lambda i: (0, i)),        # x block (batch lanes)
                pl.BlockSpec((N, N), lambda i: (0, 0)),              # A (resident)
                pl.BlockSpec((N, D), lambda i: (0, 0)),              # E (resident)
                pl.BlockSpec((D, K * CI, CO), lambda i: (0, 0, 0)),  # W (resident)
                pl.BlockSpec((N, CO), lambda i: (0, 0)),             # bias (resident)
            ],
            out_specs=pl.BlockSpec((TB * N, CO), lambda i: (i, 0)),
        ),
        compiler_params=pltpu.CompilerParams(
            dimension_semantics=("parallel",),
            vmem_limit_bytes=vmem_limit),
    )(x_t, A_bf, E, w3, bias)
    return out2d.reshape(B, N, CO)


# ---------------------------------------------------------------------------
# Pure-JAX reference (replica of the PyTorch forward) for verification.
# ---------------------------------------------------------------------------
def avwgcn_reference(x, E, weights_pool, bias_pool, cheb_k):
    N = E.shape[0]
    A = jax.nn.softmax(jax.nn.relu(E @ E.T), axis=1)
    sset = [jnp.eye(N, dtype=jnp.float32), A]
    for _ in range(2, cheb_k):
        sset.append(2.0 * A @ sset[-1] - sset[-2])
    S = jnp.stack(sset, axis=0)                                    # (K, N, N)
    weights = jnp.einsum('nd,dkio->nkio', E, weights_pool)         # (N, K, CI, CO)
    bias = E @ bias_pool                                           # (N, CO)
    x_g = jnp.einsum('knm,bmc->bknc', S, x).transpose(0, 2, 1, 3)  # (B, N, K, CI)
    return jnp.einsum('bnki,nkio->bno', x_g, weights) + bias


if __name__ == "__main__":
    # Small shapes consistent with the module.
    B, N = 2, 16            # batch, number of graph nodes
    dim_in, dim_out = 4, 32
    cheb_k, embed_dim = 3, 8

    key = jax.random.PRNGKey(0)
    kx, ke, kw, kb = jax.random.split(key, 4)
    x = jax.random.normal(kx, (B, N, dim_in), dtype=jnp.float32)
    node_embeddings = jax.random.normal(ke, (N, embed_dim), dtype=jnp.float32)
    weights_pool = jax.random.normal(kw, (embed_dim, cheb_k, dim_in, dim_out),
                                     dtype=jnp.float32)
    bias_pool = jax.random.normal(kb, (embed_dim, dim_out), dtype=jnp.float32)

    out = avwgcn_forward(x, node_embeddings, weights_pool, bias_pool, cheb_k)
    out = jax.block_until_ready(out)

    ref = avwgcn_reference(x, node_embeddings, weights_pool, bias_pool, cheb_k)
    assert out.shape == (B, N, dim_out)
    err = float(jnp.max(jnp.abs(out - ref)))
    scale = float(jnp.max(jnp.abs(ref)))
    # bf16 MXU operands (f32 accumulation) -> tolerance relative to output magnitude.
    assert err <= 3e-2 * scale + 1e-2, f"max abs diff {err} vs ref scale {scale}"

    print("KERNEL_OK")
</pallas_src>

<mosaic_0001>
module attributes {stable_mosaic.version = 11 : i64} {
  func.func @_prep_kernel(%arg0: memref<16x8xf32, #tpu.memory_space<vmem>>, %arg1: memref<8x32xf32, #tpu.memory_space<vmem>>, %arg2: memref<16x16xbf16, #tpu.memory_space<vmem>>, %arg3: memref<16x32xf32, #tpu.memory_space<vmem>>) attributes {dimension_semantics = [], scalar_prefetch = 0 : i64, scratch_operands = 0 : i64, tpu.core_type = #tpu.core_type<tc>} {
    %c0 = arith.constant 0 : index
    %c0_0 = arith.constant 0 : index
    %0 = vector.load %arg0[%c0, %c0_0] : memref<16x8xf32, #tpu.memory_space<vmem>>, vector<16x8xf32>
    %1 = tpu.transpose %0, [1, 0] : vector<16x8xf32> -> vector<8x16xf32>
    %cst = arith.constant dense<0.000000e+00> : vector<16x16xf32>
    %2 = tpu.matmul %0, %1, %cst {dimension_numbers = #tpu.dot_dimension_numbers<[1], [0], [0], [1], [0, 0, 1, 1], [], []>} : vector<16x8xf32>, vector<8x16xf32>, vector<16x16xf32> -> vector<16x16xf32>
    %cst_1 = arith.constant 0.000000e+00 : f32
    %3 = vector.broadcast %cst_1 : f32 to vector<16x16xf32>
    %4 = arith.maximumf %2, %3 : vector<16x16xf32>
    %cst_2 = arith.constant dense<0xFF800000> : vector<16xf32>
    %5 = vector.multi_reduction <maximumf>, %4, %cst_2 [1] : vector<16x16xf32> to vector<16xf32>
    %6 = vector.shape_cast %5 : vector<16xf32> to vector<16x1xf32>
    %7 = vector.broadcast %6 : vector<16x1xf32> to vector<16x16xf32>
    %8 = arith.subf %4, %7 : vector<16x16xf32>
    %9 = math.exp %8 : vector<16x16xf32>
    %cst_3 = arith.constant dense<0.000000e+00> : vector<16xf32>
    %10 = vector.multi_reduction <add>, %9, %cst_3 [1] : vector<16x16xf32> to vector<16xf32>
    %11 = vector.shape_cast %10 : vector<16xf32> to vector<16x1xf32>
    %12 = vector.broadcast %11 : vector<16x1xf32> to vector<16x16xf32>
    %13 = arith.divf %9, %12 : vector<16x16xf32>
    %14 = arith.truncf %13 : vector<16x16xf32> to vector<16x16xbf16>
    %c0_4 = arith.constant 0 : index
    %c0_5 = arith.constant 0 : index
    %15 = vector.load %arg2[%c0_4, %c0_5] : memref<16x16xbf16, #tpu.memory_space<vmem>>, vector<16x16xbf16>
    tpu.vector_store %arg2[%c0_4, %c0_5], %14 {strides = array<i32>} : memref<16x16xbf16, #tpu.memory_space<vmem>>, vector<16x16xbf16>,
    %c0_6 = arith.constant 0 : index
    %c0_7 = arith.constant 0 : index
    %16 = vector.load %arg1[%c0_6, %c0_7] : memref<8x32xf32, #tpu.memory_space<vmem>>, vector<8x32xf32>
    %cst_8 = arith.constant dense<0.000000e+00> : vector<16x32xf32>
    %17 = tpu.matmul %0, %16, %cst_8 {dimension_numbers = #tpu.dot_dimension_numbers<[1], [0], [0], [1], [0, 0, 1, 1], [], []>} : vector<16x8xf32>, vector<8x32xf32>, vector<16x32xf32> -> vector<16x32xf32>
    %c0_9 = arith.constant 0 : index
    %c0_10 = arith.constant 0 : index
    %18 = vector.load %arg3[%c0_9, %c0_10] : memref<16x32xf32, #tpu.memory_space<vmem>>, vector<16x32xf32>
    tpu.vector_store %arg3[%c0_9, %c0_10], %17 {strides = array<i32>} : memref<16x32xf32, #tpu.memory_space<vmem>>, vector<16x32xf32>,
    return
  }
}

</mosaic_0001>

<bundles_post_ra>
// kernel: tpu_custom_call.1
= control target key start
LH: loop header
LB: loop body
LE: loop exit
PB: predicated region body
PF: predicated region fallthrough
CT: control target
= control target key end

     0   :  { %9 = vsyncpa [#allocation3], 0  ;;  %vm17_vm0 = vcmask 64512   ;;  %s296_s0 = inlined_call_operand.vmem [shape: f32[16,8], index: 0, kind: input, shape index: {}]   ;;  %s297_s1 = inlined_call_operand.vmem [shape: f32[8,32], index: 1, kind: input, shape index: {}]   ;;  %s298_s2 = inlined_call_operand.hbm [shape: bf16[16,16], index: 2, kind: output, shape index: {0}]   ;;  %s299_s3 = inlined_call_operand.hbm [shape: f32[16,32], index: 3, kind: output, shape index: {1}]  }
   0x1   :  { %v16_v0 = vld [vmem:[%s296_s0 + $0x8] sm:$0xff] }
   0x2   :  { %10 = vsyncpa [#allocation5], 0  ;;  %166 = vmatpush.xpose.msk.msra.mxu0 %vm17_vm0, %v16_v0  ;;  %172 = vmatpush.xpose.msk.msra.mxu2 %vm17_vm0, %v16_v0  ;;  %v15_v1 = vld [vmem:[%s296_s0] sm:$0xff]  ;;  %vm49_vm1 = vcmask 130048   ;;  %s149_s20 = sshll.u32 %s299_s3, 4  ;;  %vm127_vm2 = vcmask 261120   ;;  %s150_s20 = int_to_ptr.hbm [resolvable:$true] %s149_s20 }
   0x3   :  { %v103_v8 = vld [vmem:[%s297_s1] sm:$0xff]  ;;  %s241_s1 = smov [#allocation4]   ;;  %s242_s21 = smov 128   ;;  %vm100_vm7 = vcmask 125952  }
   0x4   :  { %174 = vmatpush.msra.mxu3 %v103_v8  ;;  %119 = vmatpush.msra.mxu1 %v103_v8  ;;  %s147_s17 = sshll.u32 %s241_s1, 4  ;;  %s243_s22 = smov 8   ;;  %s148_s17 = int_to_ptr.vmem [resolvable:$true] %s147_s17 }
   0x5   :  { %171 = vmatmul.msk.f32.vlgmr.msra.gmra.mxu3 %vm17_vm0, %v16_v0  ;;  %170 = vmatmul.msk.f32.vlgmr.msra.gmra.mxu1 %vm17_vm0, %v15_v1  ;;  %s244_s3 = smov [#allocation2]   ;;  %s136_s26 = sshll.u32 %s298_s2, 4  ;;  %s137_s26 = int_to_ptr.hbm [resolvable:$true] %s136_s26 }
   0x6   :  { %167 = vmatpush.xpose.msk.msra.mxu0 %vm17_vm0, %v15_v1  ;;  %173 = vmatpush.xpose.msk.msra.mxu2 %vm17_vm0, %v15_v1  ;;  %s134_s23 = sshll.u32 %s244_s3, 4  ;;  %s245_s27 = smov 64   ;;  %s135_s23 = int_to_ptr.vmem [resolvable:$true] %s134_s23 }
   0x7   :  { %s246_s28 = smov 4  }
   0x9   :  { %168 = vmatmul.msk.f32.vlgmr.msra.gmra.mxu0 %vm17_vm0, %v15_v1  ;;  %169 = vmatmul.msk.f32.vlgmr.msra.gmra.mxu2 %vm17_vm0, %v16_v0 }
  0x82   :  { %v121_v19 = vpop.f32.mrf.mxu1 }
  0x83   :  { %128 = vst.msk [vmem:[#allocation4] sm:$0xff] %vm127_vm2, %v121_v19 }
  0x86   :  { %v41_v2 = vpop.f32.mrf.mxu0 }
  0x87   :  { %v47_v3 = vmax.f32 %v41_v2, 0.0 }
  0x88   :  { %v124_v20 = vpop.f32.mrf.mxu3 }
  0x89   :  { %v50_v4 = vsel %vm49_vm1, %v47_v3, -inf  ;;  %129 = vst.msk [vmem:[#allocation4 + $0x8] sm:$0xff] %vm127_vm2, %v124_v20 }
  0x8a   :  { %51 = vmax.xlane.f32.xlu0 %v50_v4  ;;  %155 = dma.vmem_to_hbm [thread:$0]  %s148_s17, 256, %s150_s20, [#allocation5], %s242_s21, %s242_s21, %s243_s22  }
  0x8c   :  { %v44_v5 = vpop.f32.mrf.mxu2 }
  0x8d   :  { %v48_v6 = vmax.f32 %v44_v5, 0.0 }
  0x8f   :  { %v53_v7 = vsel %vm49_vm1, %v48_v6, -inf }
  0x92   :  { %54 = vmax.xlane.f32.xlu0 %v53_v7 }
  0xfd   :  { %v52_v9 = vpop.xlane.xlu0 %51 }
  0xfe   :  { %v56_v10 = vsub.f32 %v47_v3, %v52_v9 }
 0x100   :  { %v58_v11 = vmul.f32 1.442695, %v56_v10 }
 0x102   :  { %181 = vpow2.f32 %v58_v11 }
 0x105   :  { %v55_v12 = vpop.xlane.xlu0 %54 }
 0x106   :  { %v57_v13 = vsub.f32 %v48_v6, %v55_v12 }
 0x108   :  { %v182_v14 = vpop.eup %181  ;;  %v60_v15 = vmul.f32 1.442695, %v57_v13 }
 0x109   :  { %v62_v16 = vsel %vm49_vm1, %v182_v14, 0.0 }
 0x10a   :  { %183 = vpow2.f32 %v60_v15  ;;  %63 = vadd.xlane.f32.xlu1 %v62_v16 }
 0x110   :  { %v184_v17 = vpop.eup %183 }
 0x111   :  { %v65_v18 = vsel %vm49_vm1, %v184_v17, 0.0 }
 0x112   :  { %66 = vadd.xlane.f32.xlu1 %v65_v18 }
 0x17d   :  { %v64_v21 = vpop.xlane.xlu1 %63 }
 0x17e   :  { %185 = vrcp.f32 %v64_v21  ;;  %v79_v26 = vand.u32 2147483648, %v64_v21  ;;  %v77_v28 = vand.u32 2147483647, %v64_v21  ;;  %vm73_vm4 = vweird.f32 %v64_v21 }
 0x180   :  { %v80_v31 = vor.u32 1.1754944e-38, %v79_v26  ;;  %vm78_vm6 = vcmp.eq.f32.partialorder %v77_v28, 8.507059e+37 }
 0x184   :  { %v186_v22 = vpop.eup %185 }
 0x185   :  { %v69_v23 = vmul.f32 %v186_v22, %v64_v21  ;;  %v67_v24 = vpop.xlane.xlu1 %66  ;;  %vm74_vm3 = vweird.f32 %v186_v22 }
 0x186   :  { %187 = vrcp.f32 %v67_v24  ;;  %vm75_vm5 = vmor %vm73_vm4, %vm74_vm3  ;;  %v94_v37 = vand.u32 2147483648, %v67_v24  ;;  %v92_v39 = vand.u32 2147483647, %v67_v24  ;;  %vm88_vm9 = vweird.f32 %v67_v24 }
 0x187   :  { %v70_v25 = vsub.f32 1.0, %v69_v23 }
 0x188   :  { %v95_v42 = vor.u32 1.1754944e-38, %v94_v37  ;;  %vm93_vm11 = vcmp.eq.f32.partialorder %v92_v39, 8.507059e+37 }
 0x189   :  { %v71_v27 = vmul.f32 %v186_v22, %v70_v25 }
 0x18b   :  { %v72_v29 = vadd.f32 %v186_v22, %v71_v27 }
 0x18c   :  { %v188_v30 = vpop.eup %187 }
 0x18d   :  { %v76_v32 = vsel %vm75_vm5, %v186_v22, %v72_v29  ;;  %v84_v33 = vmul.f32 %v188_v30, %v67_v24  ;;  %vm89_vm8 = vweird.f32 %v188_v30 }
 0x18e   :  { %v81_v34 = vsel %vm78_vm6, %v80_v31, %v76_v32  ;;  %vm90_vm10 = vmor %vm88_vm9, %vm89_vm8 }
 0x18f   :  { %v85_v35 = vsub.f32 1.0, %v84_v33  ;;  %v82_v36 = vmul.f32 %v182_v14, %v81_v34 }
 0x191   :  { %v86_v38 = vmul.f32 %v188_v30, %v85_v35  ;;  %v98_v40 = vpack.c.bf16 %v82_v36, %v82_v36 }
 0x193   :  { %v87_v41 = vadd.f32 %v188_v30, %v86_v38  ;;  %101 = vst.msk [vmem:[#allocation2] sm:$0xf] %vm100_vm7, %v98_v40 }
 0x195   :  { %v91_v43 = vsel %vm90_vm10, %v188_v30, %v87_v41 }
 0x196   :  { %v96_v44 = vsel %vm93_vm11, %v95_v42, %v91_v43 }
 0x197   :  { %v97_v45 = vmul.f32 %v184_v17, %v96_v44 }
 0x199   :  { %v99_v46 = vpack.c.bf16 %v97_v45, %v97_v45 }
 0x19b   :  { %102 = vst.msk [vmem:[#allocation2 + $0x4] sm:$0xf] %vm100_vm7, %v99_v46 }
 0x19c   :  { %142 = dma.vmem_to_hbm [thread:$0]  %s135_s23, 128, %s137_s26, [#allocation3], %s245_s27, %s245_s27, %s246_s28  }
 0x19d   :  { %237 = dma.done.wait [#allocation3], 128  }
 0x19e   :  { %238 = vsyncadd [#allocation3], 4294967168 }
 0x19f   :  { %239 = dma.done.wait [#allocation5], 256  }
 0x1a0   :  { %240 = vsyncadd [#allocation5], 4294967040 }
 0x1a1   :  { %164 = vsyncpa [#allocation3], 1 }
 0x1a2   :  { %165 = vsyncpa [#allocation5], 1 }

</bundles_post_ra>
